<compile_context>
chip_gen: v5e
topology: v5e:2x2
jax: 0.10.0
libtpu: 0.0.40
codegen_flags: <defaults>
</compile_context>

<pallas_src>
import functools

import jax
import jax.numpy as jnp
from jax.experimental import pallas as pl
from jax.experimental.pallas import tpu as pltpu


def _round_up(n, m):
    return ((n + m - 1) // m) * m


# ---------------------------------------------------------------------------
# Kernel 1: row-tiled linear  y = x @ W^T + b
# (used for the hoisted layer-0 input projection)
# ---------------------------------------------------------------------------
def _proj_kernel(x_ref, w_ref, b_ref, o_ref):
    o_ref[...] = (
        jnp.dot(x_ref[...], w_ref[...], preferred_element_type=jnp.float32)
        + b_ref[...]
    ).astype(o_ref.dtype)


def tiled_linear(x_2d, w, b, *, tile_rows=512):
    """y = x_2d @ w.T + b.   x_2d: (N, Din); w: (Dout, Din); b: (Dout,)."""
    N, Din = x_2d.shape
    Dout = w.shape[0]
    w_t = jnp.asarray(w, jnp.float32).T            # (Din, Dout)
    b_row = jnp.asarray(b, jnp.float32).reshape(1, Dout)

    # Row tile: multiple of 8 (sublane rule); pad N so the grid divides evenly.
    tile = min(tile_rows, _round_up(N, 8))
    n_pad = _round_up(N, tile)
    x_p = jnp.pad(x_2d, ((0, n_pad - N), (0, 0))) if n_pad != N else x_2d

    y = pl.pallas_call(
        _proj_kernel,
        out_shape=jax.ShapeDtypeStruct((n_pad, Dout), jnp.float32),
        grid_spec=pltpu.PrefetchScalarGridSpec(
            num_scalar_prefetch=0,
            grid=(n_pad // tile,),
            in_specs=[
                pl.BlockSpec((tile, Din), lambda i: (i, 0)),
                # Weight / bias blocks are grid-invariant (constant index_map),
                # so Pallas does not re-fetch them per tile.
                pl.BlockSpec((Din, Dout), lambda i: (0, 0)),
                pl.BlockSpec((1, Dout), lambda i: (0, 0)),
            ],
            out_specs=pl.BlockSpec((tile, Dout), lambda i: (i, 0)),
        ),
        compiler_params=pltpu.CompilerParams(
            dimension_semantics=("parallel",),   # independent row tiles
        ),
    )(x_p, w_t, b_row)
    return y[:N] if n_pad != N else y


# ---------------------------------------------------------------------------
# Kernel 2: chunked tanh recurrence with a fused output projection.
#   pre_ref : (TT, B, H)  precomputed x@W_ih^T + b_ih + b_hh for this time chunk
#   whh_ref : (H, H)      W_hh^T
#   wout_ref: (H, K)      next projection (next layer's W_ih^T, or W_fc^T)
#   bout_ref: (1, K)      next projection's (combined) bias
#   o_ref   : (TT, B, K)  projected hidden states for this chunk
#   h_carry : (B, H)      hidden state carried sequentially across chunks
#   h_chunk : (TT, B, H)  this chunk's hidden states (scratch, then projected)
# ---------------------------------------------------------------------------
def _rnn_chunk_kernel(pre_ref, whh_ref, wout_ref, bout_ref, o_ref,
                      h_carry, h_chunk, *, chunk):
    c = pl.program_id(0)

    @pl.when(c == 0)
    def _():
        h_carry[...] = jnp.zeros_like(h_carry)

    whh = whh_ref[...]                      # hoisted out of the unrolled loop

    def step(i, h):
        h_new = jnp.tanh(
            jnp.dot(h, whh, preferred_element_type=jnp.float32) + pre_ref[i]
        )
        h_chunk[i] = h_new
        return h_new

    h_last = jax.lax.fori_loop(0, chunk, step, h_carry[...], unroll=True)
    h_carry[...] = h_last

    # Fused projection of the whole chunk: one big MXU matmul + one slab store.
    hc = h_chunk[...]                                       # (TT, B, H)
    tt, bdim, hdim = hc.shape
    y = (
        jnp.dot(hc.reshape(tt * bdim, hdim), wout_ref[...],
                preferred_element_type=jnp.float32)
        + bout_ref[...]
    )
    o_ref[...] = y.reshape(tt, bdim, -1).astype(o_ref.dtype)


def rnn_layer_fused(pre_tbh, w_hh, w_out, b_out, *, time_chunk=64):
    """tanh recurrence over precomputed pre-activations, with the *next*
    projection (next layer's input projection, or the fc head) fused in.

    pre_tbh: (T, B, H) time-major, already = x @ W_ih^T + b_ih + b_hh
    w_hh   : (H, H)  PyTorch layout
    w_out  : (K, H)  PyTorch layout (next layer's W_ih, or the fc weight)
    b_out  : (K,)    bias of that next projection (combined biases for RNN layers)
    returns (T, B, K) = w_out-projection of h_t for every t
    """
    T, B, H = pre_tbh.shape
    K = w_out.shape[0]
    chunk = min(time_chunk, T)
    t_pad = _round_up(T, chunk)
    if t_pad != T:
        # Padded trailing steps see zero pre-activations; they come *after* all
        # real steps so they cannot affect real outputs, and are sliced off.
        pre_tbh = jnp.pad(pre_tbh, ((0, t_pad - T), (0, 0), (0, 0)))

    whh_t = jnp.asarray(w_hh, jnp.float32).T       # (H, H)
    wout_t = jnp.asarray(w_out, jnp.float32).T     # (H, K)
    bout = jnp.asarray(b_out, jnp.float32).reshape(1, K)

    kernel = functools.partial(_rnn_chunk_kernel, chunk=chunk)
    out = pl.pallas_call(
        kernel,
        out_shape=jax.ShapeDtypeStruct((t_pad, B, K), jnp.float32),
        grid_spec=pltpu.PrefetchScalarGridSpec(
            num_scalar_prefetch=0,
            grid=(t_pad // chunk,),
            in_specs=[
                pl.BlockSpec((chunk, B, H), lambda c: (c, 0, 0)),
                pl.BlockSpec((H, H), lambda c: (0, 0)),
                pl.BlockSpec((H, K), lambda c: (0, 0)),
                pl.BlockSpec((1, K), lambda c: (0, 0)),
            ],
            out_specs=pl.BlockSpec((chunk, B, K), lambda c: (c, 0, 0)),
            scratch_shapes=[
                pltpu.VMEM((B, H), jnp.float32),        # hidden-state carry
                pltpu.VMEM((chunk, B, H), jnp.float32),  # chunk hidden states
            ],
        ),
        compiler_params=pltpu.CompilerParams(
            dimension_semantics=("arbitrary",),  # time chunks carry state
        ),
    )(pre_tbh, whh_t, wout_t, bout)
    return out[:T] if t_pad != T else out


# ---------------------------------------------------------------------------
# Full forward pass
# ---------------------------------------------------------------------------
@jax.jit
def net_forward(x, params):
    """x: (B, T, input_dim) batch-first; returns (B, T, hidden_dim)."""
    B, T, D = x.shape
    rnn = params["rnn"]
    L = len(rnn)
    H = rnn[0]["w_hh"].shape[0]

    # time-major once at the boundary (input is the only raw-D activation)
    xt = jnp.transpose(x, (1, 0, 2)).reshape(T * B, D)

    # Layer-0 input projection, hoisted out of the recurrence (tiled matmul).
    b0 = rnn[0]["b_ih"] + rnn[0]["b_hh"]
    pre = tiled_linear(xt, rnn[0]["w_ih"], b0).reshape(T, B, H)

    # Each recurrence kernel fuses the next projection:
    #   layers 0..L-2 emit layer l+1's pre-activations,
    #   the last layer emits the fc head output directly.
    for l in range(L):
        if l + 1 < L:
            w_out = rnn[l + 1]["w_ih"]
            b_out = rnn[l + 1]["b_ih"] + rnn[l + 1]["b_hh"]
        else:
            w_out = params["fc"]["w"]
            b_out = params["fc"]["b"]
        pre = rnn_layer_fused(pre, rnn[l]["w_hh"], w_out, b_out)

    # pre is now fc(h_lastlayer) time-major; back to batch-first.
    return jnp.transpose(pre, (1, 0, 2))


# ---------------------------------------------------------------------------
# Deterministic parameter init (PyTorch-style U(-1/sqrt(H), 1/sqrt(H)))
# ---------------------------------------------------------------------------
def init_params(key, input_dim, hidden_dim, layers):
    bound = 1.0 / jnp.sqrt(jnp.float32(hidden_dim))
    params = {"rnn": []}
    for l in range(layers):
        d_in = input_dim if l == 0 else hidden_dim
        key, k1, k2, k3, k4 = jax.random.split(key, 5)
        params["rnn"].append(
            {
                "w_ih": jax.random.uniform(k1, (hidden_dim, d_in), jnp.float32, -bound, bound),
                "w_hh": jax.random.uniform(k2, (hidden_dim, hidden_dim), jnp.float32, -bound, bound),
                "b_ih": jax.random.uniform(k3, (hidden_dim,), jnp.float32, -bound, bound),
                "b_hh": jax.random.uniform(k4, (hidden_dim,), jnp.float32, -bound, bound),
            }
        )
    key, k1, k2 = jax.random.split(key, 3)
    params["fc"] = {
        "w": jax.random.uniform(k1, (hidden_dim, hidden_dim), jnp.float32, -bound, bound),
        "b": jax.random.uniform(k2, (hidden_dim,), jnp.float32, -bound, bound),
    }
    return params


# ---------------------------------------------------------------------------
# Pure-JAX reference (for correctness check)
# ---------------------------------------------------------------------------
def net_forward_ref(x, params):
    h_seq = x  # (B, T, D)
    for layer in params["rnn"]:
        wih, whh = layer["w_ih"], layer["w_hh"]
        b = layer["b_ih"] + layer["b_hh"]
        B = h_seq.shape[0]
        H = whh.shape[0]

        def step(h_prev, x_t):
            h_new = jnp.tanh(x_t @ wih.T + h_prev @ whh.T + b)
            return h_new, h_new

        _, ys = jax.lax.scan(step, jnp.zeros((B, H), jnp.float32),
                             jnp.transpose(h_seq, (1, 0, 2)))
        h_seq = jnp.transpose(ys, (1, 0, 2))
    return h_seq @ params["fc"]["w"].T + params["fc"]["b"]


# ---------------------------------------------------------------------------
if __name__ == "__main__":
    B, T = 2, 8
    input_dim, hidden_dim, layers = 16, 32, 2

    key = jax.random.PRNGKey(0)
    key, xkey = jax.random.split(key)
    x = jax.random.normal(xkey, (B, T, input_dim), jnp.float32)
    params = init_params(key, input_dim, hidden_dim, layers)

    out = net_forward(x, params)
    out = jax.block_until_ready(out)

    ref = net_forward_ref(x, params)
    assert out.shape == (B, T, hidden_dim), out.shape
    assert jnp.allclose(out, ref, atol=2e-5, rtol=2e-5), "mismatch vs JAX reference"

    print("KERNEL_OK")
</pallas_src>

<mosaic_0001>
module attributes {stable_mosaic.version = 11 : i64} {
  func.func @_proj_kernel(%arg0: i32, %arg1: memref<16x16xf32, #tpu.memory_space<vmem>>, %arg2: memref<16x32xf32, #tpu.memory_space<vmem>>, %arg3: memref<1x32xf32, #tpu.memory_space<vmem>>, %arg4: memref<16x32xf32, #tpu.memory_space<vmem>>) attributes {dimension_semantics = [#tpu.dimension_semantics<parallel>], iteration_bounds = array<i64: 1>, scalar_prefetch = 0 : i64, scratch_operands = 0 : i64, tpu.core_type = #tpu.core_type<tc>, window_params = [{transform_indices = @transform_0, window_bounds = array<i64: 16, 16>}, {pipeline_mode = #tpu.pipeline_mode<synchronous>, transform_indices = @transform_1, window_bounds = array<i64: 16, 32>}, {pipeline_mode = #tpu.pipeline_mode<synchronous>, transform_indices = @transform_2, window_bounds = array<i64: 1, 32>}, {transform_indices = @transform_3, window_bounds = array<i64: 16, 32>}]} {
    %c0 = arith.constant 0 : index
    %c0_0 = arith.constant 0 : index
    %0 = vector.load %arg1[%c0, %c0_0] : memref<16x16xf32, #tpu.memory_space<vmem>>, vector<16x16xf32>
    %c0_1 = arith.constant 0 : index
    %c0_2 = arith.constant 0 : index
    %1 = vector.load %arg2[%c0_1, %c0_2] : memref<16x32xf32, #tpu.memory_space<vmem>>, vector<16x32xf32>
    %cst = arith.constant dense<0.000000e+00> : vector<16x32xf32>
    %2 = tpu.matmul %0, %1, %cst {dimension_numbers = #tpu.dot_dimension_numbers<[1], [0], [0], [1], [0, 0, 1, 1], [], []>} : vector<16x16xf32>, vector<16x32xf32>, vector<16x32xf32> -> vector<16x32xf32>
    %c0_3 = arith.constant 0 : index
    %c0_4 = arith.constant 0 : index
    %3 = vector.load %arg3[%c0_3, %c0_4] : memref<1x32xf32, #tpu.memory_space<vmem>>, vector<1x32xf32>
    %4 = vector.broadcast %3 : vector<1x32xf32> to vector<16x32xf32>
    %5 = arith.addf %2, %4 : vector<16x32xf32>
    %c0_5 = arith.constant 0 : index
    %c0_6 = arith.constant 0 : index
    %6 = vector.load %arg4[%c0_5, %c0_6] : memref<16x32xf32, #tpu.memory_space<vmem>>, vector<16x32xf32>
    tpu.vector_store %arg4[%c0_5, %c0_6], %5 {strides = array<i32>} : memref<16x32xf32, #tpu.memory_space<vmem>>, vector<16x32xf32>,
    return
  }
  func.func @transform_0(%arg0: i32) -> (i32, i32) {
    %c0_i32 = arith.constant 0 : i32
    %c0_i32_0 = arith.constant 0 : i32
    return %arg0, %c0_i32 : i32, i32
  }
  func.func @transform_1(%arg0: i32) -> (i32, i32) {
    %c0_i32 = arith.constant 0 : i32
    %c0_i32_0 = arith.constant 0 : i32
    %c0_i32_1 = arith.constant 0 : i32
    return %c0_i32, %c0_i32_0 : i32, i32
  }
  func.func @transform_2(%arg0: i32) -> (i32, i32) {
    %c0_i32 = arith.constant 0 : i32
    %c0_i32_0 = arith.constant 0 : i32
    %c0_i32_1 = arith.constant 0 : i32
    return %c0_i32, %c0_i32_0 : i32, i32
  }
  func.func @transform_3(%arg0: i32) -> (i32, i32) {
    %c0_i32 = arith.constant 0 : i32
    %c0_i32_0 = arith.constant 0 : i32
    return %arg0, %c0_i32 : i32, i32
  }
}

module attributes {stable_mosaic.version = 11 : i64} {
  func.func @_rnn_chunk_kernel(%arg0: i32, %arg1: memref<8x2x32xf32, #tpu.memory_space<vmem>>, %arg2: memref<32x32xf32, #tpu.memory_space<vmem>>, %arg3: memref<32x32xf32, #tpu.memory_space<vmem>>, %arg4: memref<1x32xf32, #tpu.memory_space<vmem>>, %arg5: memref<8x2x32xf32, #tpu.memory_space<vmem>>, %arg6: memref<2x32xf32, #tpu.memory_space<vmem>>, %arg7: memref<8x2x32xf32, #tpu.memory_space<vmem>>) attributes {dimension_semantics = [#tpu.dimension_semantics<arbitrary>], iteration_bounds = array<i64: 1>, scalar_prefetch = 0 : i64, scratch_operands = 2 : i64, tpu.core_type = #tpu.core_type<tc>, window_params = [{transform_indices = @transform_0, window_bounds = array<i64: 8, 2, 32>}, {pipeline_mode = #tpu.pipeline_mode<synchronous>, transform_indices = @transform_1, window_bounds = array<i64: 32, 32>}, {pipeline_mode = #tpu.pipeline_mode<synchronous>, transform_indices = @transform_2, window_bounds = array<i64: 32, 32>}, {pipeline_mode = #tpu.pipeline_mode<synchronous>, transform_indices = @transform_3, window_bounds = array<i64: 1, 32>}, {transform_indices = @transform_4, window_bounds = array<i64: 8, 2, 32>}]} {
    %c0_i32 = arith.constant 0 : i32
    %0 = arith.cmpi eq, %arg0, %c0_i32 : i32
    %1 = arith.extui %0 : i1 to i32
    %c0_i32_0 = arith.constant 0 : i32
    %2 = arith.cmpi ne, %1, %c0_i32_0 : i32
    scf.if %2 {
      %cst_57 = arith.constant 0.000000e+00 : f32
      %95 = vector.broadcast %cst_57 : f32 to vector<2x32xf32>
      %c0_58 = arith.constant 0 : index
      %c0_59 = arith.constant 0 : index
      %96 = vector.load %arg6[%c0_58, %c0_59] : memref<2x32xf32, #tpu.memory_space<vmem>>, vector<2x32xf32>
      tpu.vector_store %arg6[%c0_58, %c0_59], %95 {strides = array<i32>} : memref<2x32xf32, #tpu.memory_space<vmem>>, vector<2x32xf32>,
    } else {
    }
    %c0 = arith.constant 0 : index
    %c0_1 = arith.constant 0 : index
    %3 = vector.load %arg2[%c0, %c0_1] : memref<32x32xf32, #tpu.memory_space<vmem>>, vector<32x32xf32>
    %c0_2 = arith.constant 0 : index
    %c0_3 = arith.constant 0 : index
    %4 = vector.load %arg6[%c0_2, %c0_3] : memref<2x32xf32, #tpu.memory_space<vmem>>, vector<2x32xf32>
    %c0_i32_4 = arith.constant 0 : i32
    %cst = arith.constant dense<0.000000e+00> : vector<2x32xf32>
    %5 = tpu.matmul %4, %3, %cst {dimension_numbers = #tpu.dot_dimension_numbers<[1], [0], [0], [1], [0, 0, 1, 1], [], []>} : vector<2x32xf32>, vector<32x32xf32>, vector<2x32xf32> -> vector<2x32xf32>
    %6 = arith.index_cast %c0_i32_4 : i32 to index
    %c0_5 = arith.constant 0 : index
    %c0_6 = arith.constant 0 : index
    %7 = vector.load %arg1[%6, %c0_5, %c0_6] : memref<8x2x32xf32, #tpu.memory_space<vmem>>, vector<1x2x32xf32>
    %8 = vector.shape_cast %7 : vector<1x2x32xf32> to vector<2x32xf32>
    %9 = arith.addf %5, %8 : vector<2x32xf32>
    %10 = math.tanh %9 : vector<2x32xf32>
    %11 = arith.index_cast %c0_i32_4 : i32 to index
    %c0_7 = arith.constant 0 : index
    %c0_8 = arith.constant 0 : index
    %12 = vector.load %arg7[%11, %c0_7, %c0_8] : memref<8x2x32xf32, #tpu.memory_space<vmem>>, vector<1x2x32xf32>
    %13 = vector.shape_cast %12 : vector<1x2x32xf32> to vector<2x32xf32>
    %14 = vector.shape_cast %10 : vector<2x32xf32> to vector<1x2x32xf32>
    tpu.vector_store %arg7[%11, %c0_7, %c0_8], %14 {strides = array<i32>} : memref<8x2x32xf32, #tpu.memory_space<vmem>>, vector<1x2x32xf32>,
    %c1_i32 = arith.constant 1 : i32
    %cst_9 = arith.constant dense<0.000000e+00> : vector<2x32xf32>
    %15 = tpu.matmul %10, %3, %cst_9 {dimension_numbers = #tpu.dot_dimension_numbers<[1], [0], [0], [1], [0, 0, 1, 1], [], []>} : vector<2x32xf32>, vector<32x32xf32>, vector<2x32xf32> -> vector<2x32xf32>
    %16 = arith.index_cast %c1_i32 : i32 to index
    %c0_10 = arith.constant 0 : index
    %c0_11 = arith.constant 0 : index
    %17 = vector.load %arg1[%16, %c0_10, %c0_11] : memref<8x2x32xf32, #tpu.memory_space<vmem>>, vector<1x2x32xf32>
    %18 = vector.shape_cast %17 : vector<1x2x32xf32> to vector<2x32xf32>
    %19 = arith.addf %15, %18 : vector<2x32xf32>
    %20 = math.tanh %19 : vector<2x32xf32>
    %21 = arith.index_cast %c1_i32 : i32 to index
    %c0_12 = arith.constant 0 : index
    %c0_13 = arith.constant 0 : index
    %22 = vector.load %arg7[%21, %c0_12, %c0_13] : memref<8x2x32xf32, #tpu.memory_space<vmem>>, vector<1x2x32xf32>
    %23 = vector.shape_cast %22 : vector<1x2x32xf32> to vector<2x32xf32>
    %24 = vector.shape_cast %20 : vector<2x32xf32> to vector<1x2x32xf32>
    tpu.vector_store %arg7[%21, %c0_12, %c0_13], %24 {strides = array<i32>} : memref<8x2x32xf32, #tpu.memory_space<vmem>>, vector<1x2x32xf32>,
    %c2_i32 = arith.constant 2 : i32
    %cst_14 = arith.constant dense<0.000000e+00> : vector<2x32xf32>
    %25 = tpu.matmul %20, %3, %cst_14 {dimension_numbers = #tpu.dot_dimension_numbers<[1], [0], [0], [1], [0, 0, 1, 1], [], []>} : vector<2x32xf32>, vector<32x32xf32>, vector<2x32xf32> -> vector<2x32xf32>
    %26 = arith.index_cast %c2_i32 : i32 to index
    %c0_15 = arith.constant 0 : index
    %c0_16 = arith.constant 0 : index
    %27 = vector.load %arg1[%26, %c0_15, %c0_16] : memref<8x2x32xf32, #tpu.memory_space<vmem>>, vector<1x2x32xf32>
    %28 = vector.shape_cast %27 : vector<1x2x32xf32> to vector<2x32xf32>
    %29 = arith.addf %25, %28 : vector<2x32xf32>
    %30 = math.tanh %29 : vector<2x32xf32>
    %31 = arith.index_cast %c2_i32 : i32 to index
    %c0_17 = arith.constant 0 : index
    %c0_18 = arith.constant 0 : index
    %32 = vector.load %arg7[%31, %c0_17, %c0_18] : memref<8x2x32xf32, #tpu.memory_space<vmem>>, vector<1x2x32xf32>
    %33 = vector.shape_cast %32 : vector<1x2x32xf32> to vector<2x32xf32>
    %34 = vector.shape_cast %30 : vector<2x32xf32> to vector<1x2x32xf32>
    tpu.vector_store %arg7[%31, %c0_17, %c0_18], %34 {strides = array<i32>} : memref<8x2x32xf32, #tpu.memory_space<vmem>>, vector<1x2x32xf32>,
    %c3_i32 = arith.constant 3 : i32
    %cst_19 = arith.constant dense<0.000000e+00> : vector<2x32xf32>
    %35 = tpu.matmul %30, %3, %cst_19 {dimension_numbers = #tpu.dot_dimension_numbers<[1], [0], [0], [1], [0, 0, 1, 1], [], []>} : vector<2x32xf32>, vector<32x32xf32>, vector<2x32xf32> -> vector<2x32xf32>
    %36 = arith.index_cast %c3_i32 : i32 to index
    %c0_20 = arith.constant 0 : index
    %c0_21 = arith.constant 0 : index
    %37 = vector.load %arg1[%36, %c0_20, %c0_21] : memref<8x2x32xf32, #tpu.memory_space<vmem>>, vector<1x2x32xf32>
    %38 = vector.shape_cast %37 : vector<1x2x32xf32> to vector<2x32xf32>
    %39 = arith.addf %35, %38 : vector<2x32xf32>
    %40 = math.tanh %39 : vector<2x32xf32>
    %41 = arith.index_cast %c3_i32 : i32 to index
    %c0_22 = arith.constant 0 : index
    %c0_23 = arith.constant 0 : index
    %42 = vector.load %arg7[%41, %c0_22, %c0_23] : memref<8x2x32xf32, #tpu.memory_space<vmem>>, vector<1x2x32xf32>
    %43 = vector.shape_cast %42 : vector<1x2x32xf32> to vector<2x32xf32>
    %44 = vector.shape_cast %40 : vector<2x32xf32> to vector<1x2x32xf32>
    tpu.vector_store %arg7[%41, %c0_22, %c0_23], %44 {strides = array<i32>} : memref<8x2x32xf32, #tpu.memory_space<vmem>>, vector<1x2x32xf32>,
    %c4_i32 = arith.constant 4 : i32
    %cst_24 = arith.constant dense<0.000000e+00> : vector<2x32xf32>
    %45 = tpu.matmul %40, %3, %cst_24 {dimension_numbers = #tpu.dot_dimension_numbers<[1], [0], [0], [1], [0, 0, 1, 1], [], []>} : vector<2x32xf32>, vector<32x32xf32>, vector<2x32xf32> -> vector<2x32xf32>
    %46 = arith.index_cast %c4_i32 : i32 to index
    %c0_25 = arith.constant 0 : index
    %c0_26 = arith.constant 0 : index
    %47 = vector.load %arg1[%46, %c0_25, %c0_26] : memref<8x2x32xf32, #tpu.memory_space<vmem>>, vector<1x2x32xf32>
    %48 = vector.shape_cast %47 : vector<1x2x32xf32> to vector<2x32xf32>
    %49 = arith.addf %45, %48 : vector<2x32xf32>
    %50 = math.tanh %49 : vector<2x32xf32>
    %51 = arith.index_cast %c4_i32 : i32 to index
    %c0_27 = arith.constant 0 : index
    %c0_28 = arith.constant 0 : index
    %52 = vector.load %arg7[%51, %c0_27, %c0_28] : memref<8x2x32xf32, #tpu.memory_space<vmem>>, vector<1x2x32xf32>
    %53 = vector.shape_cast %52 : vector<1x2x32xf32> to vector<2x32xf32>
    %54 = vector.shape_cast %50 : vector<2x32xf32> to vector<1x2x32xf32>
    tpu.vector_store %arg7[%51, %c0_27, %c0_28], %54 {strides = array<i32>} : memref<8x2x32xf32, #tpu.memory_space<vmem>>, vector<1x2x32xf32>,
    %c5_i32 = arith.constant 5 : i32
    %cst_29 = arith.constant dense<0.000000e+00> : vector<2x32xf32>
    %55 = tpu.matmul %50, %3, %cst_29 {dimension_numbers = #tpu.dot_dimension_numbers<[1], [0], [0], [1], [0, 0, 1, 1], [], []>} : vector<2x32xf32>, vector<32x32xf32>, vector<2x32xf32> -> vector<2x32xf32>
    %56 = arith.index_cast %c5_i32 : i32 to index
    %c0_30 = arith.constant 0 : index
    %c0_31 = arith.constant 0 : index
    %57 = vector.load %arg1[%56, %c0_30, %c0_31] : memref<8x2x32xf32, #tpu.memory_space<vmem>>, vector<1x2x32xf32>
    %58 = vector.shape_cast %57 : vector<1x2x32xf32> to vector<2x32xf32>
    %59 = arith.addf %55, %58 : vector<2x32xf32>
    %60 = math.tanh %59 : vector<2x32xf32>
    %61 = arith.index_cast %c5_i32 : i32 to index
    %c0_32 = arith.constant 0 : index
    %c0_33 = arith.constant 0 : index
    %62 = vector.load %arg7[%61, %c0_32, %c0_33] : memref<8x2x32xf32, #tpu.memory_space<vmem>>, vector<1x2x32xf32>
    %63 = vector.shape_cast %62 : vector<1x2x32xf32> to vector<2x32xf32>
    %64 = vector.shape_cast %60 : vector<2x32xf32> to vector<1x2x32xf32>
    tpu.vector_store %arg7[%61, %c0_32, %c0_33], %64 {strides = array<i32>} : memref<8x2x32xf32, #tpu.memory_space<vmem>>, vector<1x2x32xf32>,
    %c6_i32 = arith.constant 6 : i32
    %cst_34 = arith.constant dense<0.000000e+00> : vector<2x32xf32>
    %65 = tpu.matmul %60, %3, %cst_34 {dimension_numbers = #tpu.dot_dimension_numbers<[1], [0], [0], [1], [0, 0, 1, 1], [], []>} : vector<2x32xf32>, vector<32x32xf32>, vector<2x32xf32> -> vector<2x32xf32>
    %66 = arith.index_cast %c6_i32 : i32 to index
    %c0_35 = arith.constant 0 : index
    %c0_36 = arith.constant 0 : index
    %67 = vector.load %arg1[%66, %c0_35, %c0_36] : memref<8x2x32xf32, #tpu.memory_space<vmem>>, vector<1x2x32xf32>
    %68 = vector.shape_cast %67 : vector<1x2x32xf32> to vector<2x32xf32>
    %69 = arith.addf %65, %68 : vector<2x32xf32>
    %70 = math.tanh %69 : vector<2x32xf32>
    %71 = arith.index_cast %c6_i32 : i32 to index
    %c0_37 = arith.constant 0 : index
    %c0_38 = arith.constant 0 : index
    %72 = vector.load %arg7[%71, %c0_37, %c0_38] : memref<8x2x32xf32, #tpu.memory_space<vmem>>, vector<1x2x32xf32>
    %73 = vector.shape_cast %72 : vector<1x2x32xf32> to vector<2x32xf32>
    %74 = vector.shape_cast %70 : vector<2x32xf32> to vector<1x2x32xf32>
    tpu.vector_store %arg7[%71, %c0_37, %c0_38], %74 {strides = array<i32>} : memref<8x2x32xf32, #tpu.memory_space<vmem>>, vector<1x2x32xf32>,
    %c7_i32 = arith.constant 7 : i32
    %cst_39 = arith.constant dense<0.000000e+00> : vector<2x32xf32>
    %75 = tpu.matmul %70, %3, %cst_39 {dimension_numbers = #tpu.dot_dimension_numbers<[1], [0], [0], [1], [0, 0, 1, 1], [], []>} : vector<2x32xf32>, vector<32x32xf32>, vector<2x32xf32> -> vector<2x32xf32>
    %76 = arith.index_cast %c7_i32 : i32 to index
    %c0_40 = arith.constant 0 : index
    %c0_41 = arith.constant 0 : index
    %77 = vector.load %arg1[%76, %c0_40, %c0_41] : memref<8x2x32xf32, #tpu.memory_space<vmem>>, vector<1x2x32xf32>
    %78 = vector.shape_cast %77 : vector<1x2x32xf32> to vector<2x32xf32>
    %79 = arith.addf %75, %78 : vector<2x32xf32>
    %80 = math.tanh %79 : vector<2x32xf32>
    %81 = arith.index_cast %c7_i32 : i32 to index
    %c0_42 = arith.constant 0 : index
    %c0_43 = arith.constant 0 : index
    %82 = vector.load %arg7[%81, %c0_42, %c0_43] : memref<8x2x32xf32, #tpu.memory_space<vmem>>, vector<1x2x32xf32>
    %83 = vector.shape_cast %82 : vector<1x2x32xf32> to vector<2x32xf32>
    %84 = vector.shape_cast %80 : vector<2x32xf32> to vector<1x2x32xf32>
    tpu.vector_store %arg7[%81, %c0_42, %c0_43], %84 {strides = array<i32>} : memref<8x2x32xf32, #tpu.memory_space<vmem>>, vector<1x2x32xf32>,
    %c8_i32 = arith.constant 8 : i32
    %c0_44 = arith.constant 0 : index
    %c0_45 = arith.constant 0 : index
    %85 = vector.load %arg6[%c0_44, %c0_45] : memref<2x32xf32, #tpu.memory_space<vmem>>, vector<2x32xf32>
    tpu.vector_store %arg6[%c0_44, %c0_45], %80 {strides = array<i32>} : memref<2x32xf32, #tpu.memory_space<vmem>>, vector<2x32xf32>,
    %c0_46 = arith.constant 0 : index
    %c0_47 = arith.constant 0 : index
    %c0_48 = arith.constant 0 : index
    %86 = vector.load %arg7[%c0_46, %c0_47, %c0_48] : memref<8x2x32xf32, #tpu.memory_space<vmem>>, vector<8x2x32xf32>
    %87 = vector.shape_cast %86 : vector<8x2x32xf32> to vector<16x32xf32>
    %c0_49 = arith.constant 0 : index
    %c0_50 = arith.constant 0 : index
    %88 = vector.load %arg3[%c0_49, %c0_50] : memref<32x32xf32, #tpu.memory_space<vmem>>, vector<32x32xf32>
    %cst_51 = arith.constant dense<0.000000e+00> : vector<16x32xf32>
    %89 = tpu.matmul %87, %88, %cst_51 {dimension_numbers = #tpu.dot_dimension_numbers<[1], [0], [0], [1], [0, 0, 1, 1], [], []>} : vector<16x32xf32>, vector<32x32xf32>, vector<16x32xf32> -> vector<16x32xf32>
    %c0_52 = arith.constant 0 : index
    %c0_53 = arith.constant 0 : index
    %90 = vector.load %arg4[%c0_52, %c0_53] : memref<1x32xf32, #tpu.memory_space<vmem>>, vector<1x32xf32>
    %91 = vector.broadcast %90 : vector<1x32xf32> to vector<16x32xf32>
    %92 = arith.addf %89, %91 : vector<16x32xf32>
    %93 = vector.shape_cast %92 : vector<16x32xf32> to vector<8x2x32xf32>
    %c0_54 = arith.constant 0 : index
    %c0_55 = arith.constant 0 : index
    %c0_56 = arith.constant 0 : index
    %94 = vector.load %arg5[%c0_54, %c0_55, %c0_56] : memref<8x2x32xf32, #tpu.memory_space<vmem>>, vector<8x2x32xf32>
    tpu.vector_store %arg5[%c0_54, %c0_55, %c0_56], %93 {strides = array<i32>} : memref<8x2x32xf32, #tpu.memory_space<vmem>>, vector<8x2x32xf32>,
    return
  }
  func.func @transform_0(%arg0: i32) -> (i32, i32, i32) {
    %c0_i32 = arith.constant 0 : i32
    %c0_i32_0 = arith.constant 0 : i32
    %c0_i32_1 = arith.constant 0 : i32
    return %arg0, %c0_i32, %c0_i32_0 : i32, i32, i32
  }
  func.func @transform_1(%arg0: i32) -> (i32, i32) {
    %c0_i32 = arith.constant 0 : i32
    %c0_i32_0 = arith.constant 0 : i32
    %c0_i32_1 = arith.constant 0 : i32
    return %c0_i32, %c0_i32_0 : i32, i32
  }
  func.func @transform_2(%arg0: i32) -> (i32, i32) {
    %c0_i32 = arith.constant 0 : i32
    %c0_i32_0 = arith.constant 0 : i32
    %c0_i32_1 = arith.constant 0 : i32
    return %c0_i32, %c0_i32_0 : i32, i32
  }
  func.func @transform_3(%arg0: i32) -> (i32, i32) {
    %c0_i32 = arith.constant 0 : i32
    %c0_i32_0 = arith.constant 0 : i32
    %c0_i32_1 = arith.constant 0 : i32
    return %c0_i32, %c0_i32_0 : i32, i32
  }
  func.func @transform_4(%arg0: i32) -> (i32, i32, i32) {
    %c0_i32 = arith.constant 0 : i32
    %c0_i32_0 = arith.constant 0 : i32
    %c0_i32_1 = arith.constant 0 : i32
    return %arg0, %c0_i32, %c0_i32_0 : i32, i32, i32
  }
}

</mosaic_0001>

<bundles_post_ra>
// kernel: net_forward.3
= control target key start
LH: loop header
LB: loop body
LE: loop exit
PB: predicated region body
PF: predicated region fallthrough
CT: control target
= control target key end

     0   :  { %8 = vsyncpa [#allocation3], 0  ;;  %s110_s15 = smov [#allocation2]   ;;  %s111_s17 = smov 128   ;;  %s151_s0 = inlined_call_operand.vmem [shape: f32[16,16], index: 0, kind: input, shape index: {}]   ;;  %s152_s1 = inlined_call_operand.hbm [shape: f32[16,32], index: 1, kind: input, shape index: {}]   ;;  %s153_s2 = inlined_call_operand.vmem [shape: f32[1,32], index: 2, kind: input, shape index: {}]   ;;  %s154_s3 = inlined_call_operand.vmem [shape: f32[16,32], index: 3, kind: output, shape index: {}]  }
   0x1   :  { %s15_s14 = sshll.u32 %s152_s1, 4  ;;  %s17_s16 = sshll.u32 %s110_s15, 4  ;;  %s16_s14 = int_to_ptr.hbm [resolvable:$true] %s15_s14  ;;  %s18_s16 = int_to_ptr.vmem [resolvable:$true] %s17_s16 }
   0x2   :  { %s112_s18 = smov 8  }
   0x3   :  { %23 = dma.hbm_to_vmem [thread:$0]  %s16_s14, 256, %s18_s16, [#allocation3], %s111_s17, %s111_s17, %s112_s18  }
   0x4   :  { %108 = dma.done.wait [#allocation3], 256  }
   0x5   :  { %109 = vsyncadd [#allocation3], 4294967040  ;;  %v33_v0 = vld [vmem:[#allocation2 + $0x8] sm:$0xff]  ;;  %v32_v1 = vld [vmem:[#allocation2] sm:$0xff]  ;;  %vm38_vm0 = vcmask 130048   ;;  %vm68_vm1 = vcmask 261120  }
   0x6   :  { %59 = vmatpush.msra.mxu0 %v33_v0  ;;  %78 = vmatpush.msra.mxu1 %v33_v0  ;;  %v30_v2 = vld [vmem:[%s151_s0] sm:$0xff]  ;;  %v31_v3 = vld [vmem:[%s151_s0 + $0x8] sm:$0xff] }
   0x7   :  { %v83_v4 = vld [vmem:[%s153_s2] ss:$0 sm:$0xff] }
   0x8   :  { %60 = vmatpush.msra.mxu0 %v32_v1  ;;  %79 = vmatpush.msra.mxu1 %v32_v1 }
   0x9   :  { %76 = vmatmul.msk.f32.vlgmr.msra.gmra.mxu0 %vm38_vm0, %v30_v2  ;;  %77 = vmatmul.msk.f32.vlgmr.msra.gmra.mxu1 %vm38_vm0, %v31_v3 }
  0x86   :  { %v62_v5 = vpop.f32.mrf.mxu0  ;;  %v65_v6 = vpop.f32.mrf.mxu1 }
  0x87   :  { %v63_v7 = vadd.f32 %v83_v4, %v62_v5  ;;  %v66_v8 = vadd.f32 %v83_v4, %v65_v6 }
  0x89   :  { %69 = vst.msk [vmem:[%s154_s3] sm:$0xff] %vm68_vm1, %v63_v7 }
  0x8a   :  { %70 = vst.msk [vmem:[%s154_s3 + $0x8] sm:$0xff] %vm68_vm1, %v66_v8 }
  0x8b   :  { %75 = vsyncpa [#allocation3], 1 }

// kernel: net_forward.4
= control target key start
LH: loop header
LB: loop body
LE: loop exit
PB: predicated region body
PF: predicated region fallthrough
CT: control target
= control target key end

     0   :  { %vm21_vm0 = vcmask 254976   ;;  %v382_v2 = vmov 0.0   ;;  %vm29_vm1 = vcmask 261120   ;;  %s511_s1 = inlined_call_operand.vmem [shape: f32[32,32], index: 1, kind: input, shape index: {}]   ;;  %s512_s0 = inlined_call_operand.vmem [shape: f32[8,2,32], index: 0, kind: input, shape index: {}]   ;;  %s513_s2 = inlined_call_operand.vmem [shape: f32[32,32], index: 2, kind: input, shape index: {}]   ;;  %s514_s3 = inlined_call_operand.vmem [shape: f32[1,32], index: 3, kind: input, shape index: {}]   ;;  %s515_s4 = inlined_call_operand.vmem [shape: f32[8,2,32], index: 4, kind: output, shape index: {}]  }
   0x1   :  { %v26_v0 = vld [vmem:[%s511_s1 + $0x18] sm:$0xff]  ;;  %v25_v1 = vld [vmem:[%s511_s1 + $0x10] sm:$0xff]  ;;  %22 = vst.msk [vmem:[#allocation2] sm:$0x3] %vm21_vm0, %v382_v2  ;;  %v24_v3 = vld [vmem:[%s511_s1 + $0x8] sm:$0xff] }
   0x2   :  { %45 = vmatpush.msra.mxu1 %v26_v0  ;;  %101 = vmatpush.msra.mxu2 %v26_v0  ;;  %v23_v4 = vld [vmem:[%s511_s1] sm:$0xff]  ;;  %v264_v21 = vld [vmem:[%s513_s2 + $0x18] sm:$0xff]  ;;  %v263_v22 = vld [vmem:[%s513_s2 + $0x10] sm:$0xff] }
   0x3   :  { %129 = vmatpush.msra.mxu3 %v26_v0  ;;  %157 = vmatpush.msra.mxu0 %v26_v0  ;;  %v28_v6 = vld [vmem:[%s512_s0] sm:$0x3]  ;;  %v348_v11 = vld [vmem:[%s512_s0 + $0x2] sm:$0x3]  ;;  %v350_v16 = vld [vmem:[%s512_s0 + $0x4] sm:$0x3] }
   0x4   :  { %46 = vmatpush.msra.mxu1 %v25_v1  ;;  %102 = vmatpush.msra.mxu2 %v25_v1  ;;  %v262_v23 = vld [vmem:[%s513_s2 + $0x8] sm:$0xff]  ;;  %v261_v24 = vld [vmem:[%s513_s2] sm:$0xff] }
   0x5   :  { %130 = vmatpush.msra.mxu3 %v25_v1  ;;  %158 = vmatpush.msra.mxu0 %v25_v1  ;;  %v352_v25 = vld [vmem:[%s512_s0 + $0x6] sm:$0x3]  ;;  %v354_v31 = vld [vmem:[%s512_s0 + $0x8] sm:$0x3]  ;;  %v365_v35 = vld [vmem:[%s514_s3] ss:$0 sm:$0xff] }
   0x6   :  { %47 = vmatpush.msra.mxu1 %v24_v3  ;;  %103 = vmatpush.msra.mxu2 %v24_v3  ;;  %v356_v42 = vld [vmem:[%s512_s0 + $0xa] sm:$0x3]  ;;  %v358_v47 = vld [vmem:[%s512_s0 + $0xc] sm:$0x3]  ;;  %v360_v52 = vld [vmem:[%s512_s0 + $0xe] sm:$0x3] }
   0x7   :  { %131 = vmatpush.msra.mxu3 %v24_v3  ;;  %159 = vmatpush.msra.mxu0 %v24_v3 }
   0x8   :  { %48 = vmatpush.msra.mxu1 %v23_v4  ;;  %v27_v5 = vld [vmem:[#allocation2] sm:$0x3]  ;;  %104 = vmatpush.msra.mxu2 %v23_v4 }
   0x9   :  { %347 = vmatmul.msk.f32.vlgmr.msra.gmra.mxu1 %vm29_vm1, %v27_v5  ;;  %132 = vmatpush.msra.mxu3 %v23_v4 }
   0xa   :  { %73 = vmatpush.msrb.mxu1 %v26_v0  ;;  %160 = vmatpush.msra.mxu0 %v23_v4 }
   0xb   :  { %213 = vmatpush.msrb.mxu2 %v26_v0  ;;  %241 = vmatpush.msrb.mxu3 %v26_v0 }
   0xc   :  { %74 = vmatpush.msrb.mxu1 %v25_v1  ;;  %310 = vmatpush.msrb.mxu0 %v264_v21 }
   0xd   :  { %214 = vmatpush.msrb.mxu2 %v25_v1  ;;  %242 = vmatpush.msrb.mxu3 %v25_v1 }
   0xe   :  { %75 = vmatpush.msrb.mxu1 %v24_v3  ;;  %311 = vmatpush.msrb.mxu0 %v263_v22 }
   0xf   :  { %215 = vmatpush.msrb.mxu2 %v24_v3  ;;  %243 = vmatpush.msrb.mxu3 %v24_v3 }
  0x10   :  { %76 = vmatpush.msrb.mxu1 %v23_v4  ;;  %312 = vmatpush.msrb.mxu0 %v262_v23 }
  0x11   :  { %216 = vmatpush.msrb.mxu2 %v23_v4  ;;  %244 = vmatpush.msrb.mxu3 %v23_v4 }
  0x12   :  { %185 = vmatpush.msra.mxu1 %v26_v0  ;;  %313 = vmatpush.msrb.mxu0 %v261_v24 }
  0x14   :  { %186 = vmatpush.msra.mxu1 %v25_v1 }
  0x16   :  { %187 = vmatpush.msra.mxu1 %v24_v3 }
  0x18   :  { %188 = vmatpush.msra.mxu1 %v23_v4 }
  0x86   :  { %v50_v7 = vpop.f32.mrf.mxu1 }
  0x87   :  { %v51_v8 = vadd.f32 %v50_v7, %v28_v6 }
  0x89   :  { %366 = vtanh.f32 %v51_v8 }
  0x8f   :  { %v367_v9 = vpop.eup %366 }
  0x90   :  { %55 = vst.msk [vmem:[#allocation3] sm:$0x3] %vm21_vm0, %v367_v9  ;;  %349 = vmatmul.msk.f32.vlgmr.msrb.gmra.mxu1 %vm29_vm1, %v367_v9 }
  0x97   :  { %v253_v10 = vld [vmem:[#allocation3] sm:$0x3] }
  0x98   :  { %277 = vst [vmem:[#allocation1] ss:$4 sm:$0xff] %v253_v10 }
 0x10d   :  { %v78_v12 = vpop.f32.mrf.mxu1 }
 0x10e   :  { %v79_v13 = vadd.f32 %v348_v11, %v78_v12 }
 0x110   :  { %368 = vtanh.f32 %v79_v13 }
 0x116   :  { %v369_v14 = vpop.eup %368 }
 0x117   :  { %83 = vst.msk [vmem:[#allocation3 + $0x2] sm:$0x3] %vm21_vm0, %v369_v14  ;;  %351 = vmatmul.msk.f32.vlgmr.msra.gmra.mxu2 %vm29_vm1, %v369_v14 }
 0x11e   :  { %v254_v15 = vld [vmem:[#allocation3 + $0x2] sm:$0x3] }
 0x11f   :  { %279 = vst [vmem:[#allocation1 + $0x1] ss:$4 sm:$0xff] %v254_v15 }
 0x19a   :  { %v106_v17 = vpop.f32.mrf.mxu2 }
 0x19b   :  { %v107_v18 = vadd.f32 %v350_v16, %v106_v17 }
 0x19d   :  { %370 = vtanh.f32 %v107_v18 }
 0x1a3   :  { %v371_v19 = vpop.eup %370 }
 0x1a4   :  { %111 = vst.msk [vmem:[#allocation3 + $0x4] sm:$0x3] %vm21_vm0, %v371_v19  ;;  %353 = vmatmul.msk.f32.vlgmr.msra.gmra.mxu3 %vm29_vm1, %v371_v19 }
 0x1ab   :  { %v255_v20 = vld [vmem:[#allocation3 + $0x4] sm:$0x3] }
 0x1ac   :  { %281 = vst [vmem:[#allocation1 + $0x2] ss:$4 sm:$0xff] %v255_v20 }
 0x227   :  { %v134_v26 = vpop.f32.mrf.mxu3 }
 0x228   :  { %v135_v27 = vadd.f32 %v352_v25, %v134_v26 }
 0x22a   :  { %372 = vtanh.f32 %v135_v27 }
 0x230   :  { %v373_v28 = vpop.eup %372 }
 0x231   :  { %139 = vst.msk [vmem:[#allocation3 + $0x6] sm:$0x3] %vm21_vm0, %v373_v28  ;;  %355 = vmatmul.msk.f32.vlgmr.msra.gmra.mxu0 %vm29_vm1, %v373_v28 }
 0x238   :  { %v256_v29 = vld [vmem:[#allocation3 + $0x6] sm:$0x3] }
 0x239   :  { %283 = vst [vmem:[#allocation1 + $0x3] ss:$4 sm:$0xff] %v256_v29 }
 0x240   :  { %v292_v30 = vld.sshfl [vmem:[#allocation1] sm:$0xff pattern:$0x73625140] }
 0x241   :  { %362 = vmatmul.msk.f32.vlgmr.msrb.gmra.mxu0 %vm29_vm1, %v292_v30 }
 0x2ae   :  { %v162_v32 = vpop.f32.mrf.mxu0 }
 0x2af   :  { %v163_v33 = vadd.f32 %v354_v31, %v162_v32 }
 0x2b1   :  { %374 = vtanh.f32 %v163_v33 }
 0x2b7   :  { %v375_v34 = vpop.eup %374 }
 0x2b8   :  { %167 = vst.msk [vmem:[#allocation3 + $0x8] sm:$0x3] %vm21_vm0, %v375_v34  ;;  %357 = vmatmul.msk.f32.vlgmr.msra.gmra.mxu1 %vm29_vm1, %v375_v34 }
 0x2be   :  { %v315_v36 = vpop.f32.mrf.mxu0 }
 0x2bf   :  { %v316_v37 = vadd.f32 %v365_v35, %v315_v36  ;;  %v257_v38 = vld [vmem:[#allocation3 + $0x8] sm:$0x3] }
 0x2c0   :  { %285 = vst [vmem:[#allocation1 + $0x20] ss:$4 sm:$0xff] %v257_v38 }
 0x2c1   :  { %v323_v39 = vrot.slane %v316_v37, 2  ;;  %v324_v40 = vrot.slane %v316_v37, 4  ;;  %v325_v41 = vrot.slane %v316_v37, 6  ;;  %335 = vst.msk [vmem:[%s515_s4] sm:$0x3] %vm21_vm0, %v316_v37 }
 0x2c3   :  { %336 = vst.msk [vmem:[%s515_s4 + $0x2] sm:$0x3] %vm21_vm0, %v323_v39 }
 0x2c4   :  { %337 = vst.msk [vmem:[%s515_s4 + $0x4] sm:$0x3] %vm21_vm0, %v324_v40 }
 0x2c5   :  { %338 = vst.msk [vmem:[%s515_s4 + $0x6] sm:$0x3] %vm21_vm0, %v325_v41 }
 0x335   :  { %v190_v43 = vpop.f32.mrf.mxu1 }
 0x336   :  { %v191_v44 = vadd.f32 %v356_v42, %v190_v43 }
 0x338   :  { %376 = vtanh.f32 %v191_v44 }
 0x33e   :  { %v377_v45 = vpop.eup %376 }
 0x33f   :  { %195 = vst.msk [vmem:[#allocation3 + $0xa] sm:$0x3] %vm21_vm0, %v377_v45  ;;  %359 = vmatmul.msk.f32.vlgmr.msrb.gmra.mxu2 %vm29_vm1, %v377_v45 }
 0x346   :  { %v258_v46 = vld [vmem:[#allocation3 + $0xa] sm:$0x3] }
 0x347   :  { %287 = vst [vmem:[#allocation1 + $0x21] ss:$4 sm:$0xff] %v258_v46 }
 0x3c2   :  { %v218_v48 = vpop.f32.mrf.mxu2 }
 0x3c3   :  { %v219_v49 = vadd.f32 %v358_v47, %v218_v48 }
 0x3c5   :  { %378 = vtanh.f32 %v219_v49 }
 0x3cb   :  { %v379_v50 = vpop.eup %378 }
 0x3cc   :  { %223 = vst.msk [vmem:[#allocation3 + $0xc] sm:$0x3] %vm21_vm0, %v379_v50  ;;  %361 = vmatmul.msk.f32.vlgmr.msrb.gmra.mxu3 %vm29_vm1, %v379_v50 }
 0x3d3   :  { %v259_v51 = vld [vmem:[#allocation3 + $0xc] sm:$0x3] }
 0x3d4   :  { %289 = vst [vmem:[#allocation1 + $0x22] ss:$4 sm:$0xff] %v259_v51 }
 0x44f   :  { %v246_v53 = vpop.f32.mrf.mxu3 }
 0x450   :  { %v247_v54 = vadd.f32 %v360_v52, %v246_v53 }
 0x452   :  { %380 = vtanh.f32 %v247_v54 }
 0x458   :  { %v381_v55 = vpop.eup %380 }
 0x459   :  { %251 = vst.msk [vmem:[#allocation3 + $0xe] sm:$0x3] %vm21_vm0, %v381_v55 }
 0x45a   :  { %252 = vst.msk [vmem:[#allocation2] sm:$0x3] %vm21_vm0, %v381_v55 }
 0x460   :  { %v260_v56 = vld [vmem:[#allocation3 + $0xe] sm:$0x3] }
 0x461   :  { %291 = vst [vmem:[#allocation1 + $0x23] ss:$4 sm:$0xff] %v260_v56 }
 0x468   :  { %v293_v57 = vld.sshfl [vmem:[#allocation1 + $0x20] sm:$0xff pattern:$0x73625140] }
 0x469   :  { %363 = vmatmul.msk.f32.gmra.mxu0 %vm29_vm1, %v293_v57 }
 0x4e6   :  { %v318_v58 = vpop.f32.mrf.mxu0 }
 0x4e7   :  { %v319_v59 = vadd.f32 %v365_v35, %v318_v58 }
 0x4e9   :  { %v326_v60 = vrot.slane %v319_v59, 2  ;;  %v327_v61 = vrot.slane %v319_v59, 4  ;;  %v328_v62 = vrot.slane %v319_v59, 6  ;;  %339 = vst.msk [vmem:[%s515_s4 + $0x8] sm:$0x3] %vm21_vm0, %v319_v59 }
 0x4eb   :  { %340 = vst.msk [vmem:[%s515_s4 + $0xa] sm:$0x3] %vm21_vm0, %v326_v60 }
 0x4ec   :  { %341 = vst.msk [vmem:[%s515_s4 + $0xc] sm:$0x3] %vm21_vm0, %v327_v61 }
 0x4ed   :  { %342 = vst.msk [vmem:[%s515_s4 + $0xe] sm:$0x3] %vm21_vm0, %v328_v62 }

</bundles_post_ra>
